<compile_context>
chip_gen: v7x
topology: tpu7x:2x2x1
jax: 0.10.0
libtpu: 0.0.40
codegen_flags: <defaults>
</compile_context>

<pallas_src>
import functools

import jax
import jax.numpy as jnp
from jax.experimental import pallas as pl
from jax.experimental.pallas import tpu as pltpu


def _round_up(n, k):
    return ((n + k - 1) // k) * k


# --------------------------------------------------------------------------- kernel


def _mlp_kernel(xT_ref, w1_ref, b1_ref, w2_ref, b2_ref, w3_ref, b3_ref, o_ref,
                *, bf16_act=False):
    # ---- layer1 (2 -> m) on the VPU: a K=2 matmul just wastes an MXU
    # fill/drain round-trip, and VALU slots sit in slack under the EUP (tanh)
    # bottleneck of this kernel.
    x0 = xT_ref[0:1, :]                                       # (1, tb)
    x1 = xT_ref[1:2, :]                                       # (1, tb)
    h1 = w1_ref[:, 0:1] * x0 + w1_ref[:, 1:2] * x1 + b1_ref[...]     # (m, tb)
    if bf16_act:        # optional v6e/v7x bf16 EUP path (never use on v5e)
        h1 = jnp.tanh(h1.astype(jnp.bfloat16)).astype(jnp.float32)
    else:
        h1 = jnp.tanh(h1)

    # ---- layer2 (m -> m) on the MXU, f32 accumulation.
    h2 = jnp.dot(w2_ref[...], h1, preferred_element_type=jnp.float32) + b2_ref[...]
    if bf16_act:
        h2 = jnp.tanh(h2.astype(jnp.bfloat16)).astype(jnp.float32)
    else:
        h2 = jnp.tanh(h2)                                     # (m, tb)

    # ---- layer10 (m -> 1): (1, m) @ (m, tb) -> (1, tb), lane-dense result.
    y = jnp.dot(w3_ref[...], h2, preferred_element_type=jnp.float32) + b3_ref[0]
    o_ref[...] = y.astype(o_ref.dtype)                        # full 128-lane stores


# ------------------------------------------------------------------- VMEM budgeting

_MAX_TILE = 8192      # beyond this, per-step overhead is already << 1% of step time


def _vmem_capacity_bytes():
    try:
        return int(pltpu.get_tpu_info().vmem_capacity_bytes)
    except Exception:                       # pragma: no cover - conservative fallback
        return 64 << 20                     # assume the smallest (v7x-sized) VMEM


def _weight_vmem_bytes(m, buffers):
    """Padded (8,128)-layout VMEM footprint of the resident weight/bias blocks."""
    f32 = 4
    m8 = _round_up(m, 8)
    ml = _round_up(m, 128)
    per_copy = (m8 * 128      # w1 (m, 2)  -> lane-padded to 128
                + m8 * 128    # b1 (m, 1)
                + m8 * ml     # w2 (m, m)
                + m8 * 128    # b2 (m, 1)
                + 8 * ml      # w3 (1, m)  -> sublane-padded to 8
                ) * f32
    return per_copy * buffers


def _per_batch_lane_vmem_bytes(m):
    """VMEM bytes per batch lane: double-buffered x/out tiles + live temporaries."""
    f32 = 4
    m8 = _round_up(m, 8)
    # 2x double-buffered x (2,tb)->(8,tb) and out (1,tb)->(8,tb) blocks, plus
    # ~6 live (m, tb) f32 temporaries (layer-1 broadcast expression, h1, h2, acc).
    return (2 * (8 + 8) + 6 * m8) * f32


def _pick_tile(N, m, weight_buffers, budget, tile_b):
    fixed = _weight_vmem_bytes(m, weight_buffers)
    per_tb = _per_batch_lane_vmem_bytes(m)
    fit = (budget - fixed) // per_tb                  # largest tb fitting the budget
    tb = max(128, min(_MAX_TILE, (fit // 128) * 128))
    if tile_b is not None:                            # explicit user cap
        tb = max(128, min(tb, _round_up(int(tile_b), 128)))
    tb = min(tb, _round_up(N, 128))                   # never bigger than the batch
    # Keep >= 2 grid steps so ("parallel",) can shard across v7x's 2 TensorCores.
    if N > 128:
        tb = min(tb, _round_up(-(-N // 2), 128))
    return max(tb, 128)


# --------------------------------------------------------------------------- wrapper


@functools.partial(jax.jit, static_argnums=(2, 3))
def _forward_jit(x, params, tile_b, bf16_act):
    N, Fin = x.shape
    assert Fin == 2
    m = params["w1"].shape[0]

    # Generation-aware VMEM budget (v5e/v6e: 128 MiB physical, v7x: 64 MiB);
    # keep ~20% headroom for Mosaic internal scratch.
    capacity = _vmem_capacity_bytes()
    budget = int(capacity * 0.8)

    # Single-buffer the grid-invariant weights once they are big enough to
    # matter (halves resident weight VMEM, e.g. w2 at m=2048: 32 -> 16 MiB).
    single_buf_weights = m >= 256
    weight_buffers = 1 if single_buf_weights else 2

    # Batch rides on lanes -> tiles are multiples of 128; pick the largest tile
    # that fits the budget (amortizes the ~0.35 us per-grid-step overhead).
    tb = _pick_tile(N, m, weight_buffers, budget, tile_b)
    Np = _round_up(N, tb)

    needed = _weight_vmem_bytes(m, weight_buffers) + _per_batch_lane_vmem_bytes(m) * tb
    vmem_limit = int(min(budget, max(needed * 1.25, 32 << 20)))

    # x -> (2, Np) with zero-padded tail columns (single fused XLA pass under
    # jit; the padded columns produce tanh(b) garbage that is sliced off below).
    xT = x.T if Np == N else jnp.pad(x.T, ((0, 0), (0, Np - N)))

    # PyTorch (out, in) weights are already oriented for W @ x; biases as columns.
    w1 = params["w1"]                                         # (m, 2)
    b1 = params["b1"].reshape(m, 1)
    w2 = params["w2"]                                         # (m, m)
    b2 = params["b2"].reshape(m, 1)
    w3 = params["w3"]                                         # (1, m)
    b3 = params["b3"].reshape(1)                              # scalar -> SMEM

    # Grid-invariant full-extent weight blocks (constant index_map -> resident
    # across grid steps, no per-step re-DMA; optionally single-buffered).
    if single_buf_weights:
        full = lambda shape: pl.BlockSpec(shape, lambda i: (0, 0),
                                          pipeline_mode=pl.Buffered(1))
    else:
        full = lambda shape: pl.BlockSpec(shape, lambda i: (0, 0))

    f32 = 4
    weight_param_bytes = (m * 2 + m + m * m + m + m + 1) * f32
    cost = pl.CostEstimate(
        flops=int(2 * m * (m + 3) * Np),
        transcendentals=int(2 * m * Np),
        bytes_accessed=int(12 * Np + weight_param_bytes),
    )

    kernel = functools.partial(_mlp_kernel, bf16_act=bool(bf16_act))

    yT = pl.pallas_call(
        kernel,
        out_shape=jax.ShapeDtypeStruct((1, Np), jnp.float32),
        grid=(Np // tb,),
        in_specs=[
            pl.BlockSpec((2, tb), lambda i: (0, i)),          # x: batch tiled on lanes
            full((m, 2)), full((m, 1)),                       # layer1
            full((m, m)), full((m, 1)),                       # layer2
            full((1, m)),                                     # layer10 weight
            pl.BlockSpec(memory_space=pltpu.MemorySpace.SMEM),  # layer10 bias (scalar)
        ],
        out_specs=pl.BlockSpec((1, tb), lambda i: (0, i)),    # lane-dense output row
        compiler_params=pltpu.CompilerParams(
            dimension_semantics=("parallel",),                # megacore-shardable (v7x)
            vmem_limit_bytes=vmem_limit,
        ),
        cost_estimate=cost,
    )(xT, w1, b1, w2, b2, w3, b3)

    y = yT[:, :N].T                                           # (N, 1)
    # Torch: y.squeeze(0) -- only drops dim 0 if it is size 1.
    if N == 1:
        y = jnp.squeeze(y, axis=0)
    return y


def basicnn_forward(x, params, *, tile_b=None, bf16_act=False):
    """x: (N, 2) float32. params: dict with torch-convention (out, in) weights.

    tile_b=None  -> auto-size the batch tile from the device's VMEM budget.
    bf16_act     -> optional bf16 tanh (v6e/v7x only); default off (f32 numerics).
    """
    return _forward_jit(x, params, tile_b, bf16_act)


# ---------------------------------------------------------------------- test harness


def init_params(m, key):
    """Deterministic init mimicking nn.Linear's U(-1/sqrt(fan_in), 1/sqrt(fan_in))."""
    ks = jax.random.split(key, 6)

    def uni(k, shape, fan_in):
        bound = 1.0 / jnp.sqrt(fan_in)
        return jax.random.uniform(k, shape, jnp.float32, -bound, bound)

    return {
        "w1": uni(ks[0], (m, 2), 2.0),      "b1": uni(ks[1], (m,), 2.0),
        "w2": uni(ks[2], (m, m), float(m)), "b2": uni(ks[3], (m,), float(m)),
        "w3": uni(ks[4], (1, m), float(m)), "b3": uni(ks[5], (1,), float(m)),
    }


def _ref_forward(x, p):
    y = x @ p["w1"].T + p["b1"]
    y = jnp.tanh(y) @ p["w2"].T + p["b2"]
    y = jnp.tanh(y) @ p["w3"].T + p["b3"]
    return jnp.squeeze(y, axis=0) if x.shape[0] == 1 else y


if __name__ == "__main__":
    key = jax.random.PRNGKey(0)
    k_x, k_p = jax.random.split(key)

    m = 32        # hidden width
    N = 300       # ragged batch: exercises padding + a 2-step ("parallel") grid
    x = jax.random.normal(k_x, (N, 2), jnp.float32)
    params = init_params(m, k_p)

    y = jax.block_until_ready(basicnn_forward(x, params))     # auto tile selection
    y_ref = _ref_forward(x, params)
    assert y.shape == y_ref.shape == (N, 1)
    assert jnp.allclose(y, y_ref, atol=1e-5, rtol=1e-5), "mismatch vs JAX reference"

    # N == 1 path: torch's squeeze(0) drops the batch dim.
    y1 = jax.block_until_ready(basicnn_forward(x[:1], params))
    y1_ref = _ref_forward(x[:1], params)
    assert y1.shape == y1_ref.shape == (1,)
    assert jnp.allclose(y1, y1_ref, atol=1e-5, rtol=1e-5), "mismatch (N=1) vs reference"

    print("KERNEL_OK")
</pallas_src>

<mosaic_0001>
module attributes {stable_mosaic.version = 11 : i64} {
  func.func @_mlp_kernel(%arg0: i32, %arg1: memref<2x256xf32, #tpu.memory_space<vmem>>, %arg2: memref<32x2xf32, #tpu.memory_space<vmem>>, %arg3: memref<32x1xf32, #tpu.memory_space<vmem>>, %arg4: memref<32x32xf32, #tpu.memory_space<vmem>>, %arg5: memref<32x1xf32, #tpu.memory_space<vmem>>, %arg6: memref<1x32xf32, #tpu.memory_space<vmem>>, %arg7: memref<1xf32, #tpu.memory_space<smem>>, %arg8: memref<1x256xf32, #tpu.memory_space<vmem>>) attributes {dimension_semantics = [#tpu.dimension_semantics<parallel>], iteration_bounds = array<i64: 2>, scalar_prefetch = 0 : i64, scratch_operands = 0 : i64, tpu.core_type = #tpu.core_type<tc>, window_params = [{transform_indices = @transform_0, window_bounds = array<i64: 2, 256>}, {pipeline_mode = #tpu.pipeline_mode<synchronous>, transform_indices = @transform_1, window_bounds = array<i64: 32, 2>}, {pipeline_mode = #tpu.pipeline_mode<synchronous>, transform_indices = @transform_2, window_bounds = array<i64: 32, 1>}, {pipeline_mode = #tpu.pipeline_mode<synchronous>, transform_indices = @transform_3, window_bounds = array<i64: 32, 32>}, {pipeline_mode = #tpu.pipeline_mode<synchronous>, transform_indices = @transform_4, window_bounds = array<i64: 32, 1>}, {pipeline_mode = #tpu.pipeline_mode<synchronous>, transform_indices = @transform_5, window_bounds = array<i64: 1, 32>}, {transform_indices = @transform_6, window_bounds = array<i64: 1>}, {transform_indices = @transform_7, window_bounds = array<i64: 1, 256>}]} {
    %c0 = arith.constant 0 : index
    %c0_0 = arith.constant 0 : index
    %0 = vector.load %arg1[%c0, %c0_0] : memref<2x256xf32, #tpu.memory_space<vmem>>, vector<1x256xf32>
    %c1 = arith.constant 1 : index
    %c0_1 = arith.constant 0 : index
    %1 = vector.load %arg1[%c1, %c0_1] : memref<2x256xf32, #tpu.memory_space<vmem>>, vector<1x256xf32>
    %c0_2 = arith.constant 0 : index
    %c0_3 = arith.constant 0 : index
    %2 = vector.load %arg2[%c0_2, %c0_3] : memref<32x2xf32, #tpu.memory_space<vmem>>, vector<32x1xf32>
    %3 = vector.broadcast %2 : vector<32x1xf32> to vector<32x256xf32>
    %4 = vector.broadcast %0 : vector<1x256xf32> to vector<32x256xf32>
    %5 = arith.mulf %3, %4 : vector<32x256xf32>
    %c0_4 = arith.constant 0 : index
    %c1_5 = arith.constant 1 : index
    %6 = vector.load %arg2[%c0_4, %c1_5] : memref<32x2xf32, #tpu.memory_space<vmem>>, vector<32x1xf32>
    %7 = vector.broadcast %6 : vector<32x1xf32> to vector<32x256xf32>
    %8 = vector.broadcast %1 : vector<1x256xf32> to vector<32x256xf32>
    %9 = arith.mulf %7, %8 : vector<32x256xf32>
    %10 = arith.addf %5, %9 : vector<32x256xf32>
    %c0_6 = arith.constant 0 : index
    %c0_7 = arith.constant 0 : index
    %11 = vector.load %arg3[%c0_6, %c0_7] : memref<32x1xf32, #tpu.memory_space<vmem>>, vector<32x1xf32>
    %12 = vector.broadcast %11 : vector<32x1xf32> to vector<32x256xf32>
    %13 = arith.addf %10, %12 : vector<32x256xf32>
    %14 = math.tanh %13 : vector<32x256xf32>
    %c0_8 = arith.constant 0 : index
    %c0_9 = arith.constant 0 : index
    %15 = vector.load %arg4[%c0_8, %c0_9] : memref<32x32xf32, #tpu.memory_space<vmem>>, vector<32x32xf32>
    %cst = arith.constant dense<0.000000e+00> : vector<32x256xf32>
    %16 = tpu.matmul %15, %14, %cst {dimension_numbers = #tpu.dot_dimension_numbers<[1], [0], [0], [1], [0, 0, 1, 1], [], []>} : vector<32x32xf32>, vector<32x256xf32>, vector<32x256xf32> -> vector<32x256xf32>
    %c0_10 = arith.constant 0 : index
    %c0_11 = arith.constant 0 : index
    %17 = vector.load %arg5[%c0_10, %c0_11] : memref<32x1xf32, #tpu.memory_space<vmem>>, vector<32x1xf32>
    %18 = vector.broadcast %17 : vector<32x1xf32> to vector<32x256xf32>
    %19 = arith.addf %16, %18 : vector<32x256xf32>
    %20 = math.tanh %19 : vector<32x256xf32>
    %c0_12 = arith.constant 0 : index
    %c0_13 = arith.constant 0 : index
    %21 = vector.load %arg6[%c0_12, %c0_13] : memref<1x32xf32, #tpu.memory_space<vmem>>, vector<1x32xf32>
    %cst_14 = arith.constant dense<0.000000e+00> : vector<1x256xf32>
    %22 = tpu.matmul %21, %20, %cst_14 {dimension_numbers = #tpu.dot_dimension_numbers<[1], [0], [0], [1], [0, 0, 1, 1], [], []>} : vector<1x32xf32>, vector<32x256xf32>, vector<1x256xf32> -> vector<1x256xf32>
    %c0_15 = arith.constant 0 : index
    %23 = memref.load %arg7[%c0_15] : memref<1xf32, #tpu.memory_space<smem>>
    %24 = vector.broadcast %23 : f32 to vector<1x256xf32>
    %25 = arith.addf %22, %24 : vector<1x256xf32>
    %c0_16 = arith.constant 0 : index
    %c0_17 = arith.constant 0 : index
    %26 = vector.load %arg8[%c0_16, %c0_17] : memref<1x256xf32, #tpu.memory_space<vmem>>, vector<1x256xf32>
    tpu.vector_store %arg8[%c0_16, %c0_17], %25 {strides = array<i32>} : memref<1x256xf32, #tpu.memory_space<vmem>>, vector<1x256xf32>,
    return
  }
  func.func @transform_0(%arg0: i32) -> (i32, i32) {
    %c0_i32 = arith.constant 0 : i32
    %c0_i32_0 = arith.constant 0 : i32
    return %c0_i32, %arg0 : i32, i32
  }
  func.func @transform_1(%arg0: i32) -> (i32, i32) {
    %c0_i32 = arith.constant 0 : i32
    %c0_i32_0 = arith.constant 0 : i32
    %c0_i32_1 = arith.constant 0 : i32
    return %c0_i32, %c0_i32_0 : i32, i32
  }
  func.func @transform_2(%arg0: i32) -> (i32, i32) {
    %c0_i32 = arith.constant 0 : i32
    %c0_i32_0 = arith.constant 0 : i32
    %c0_i32_1 = arith.constant 0 : i32
    return %c0_i32, %c0_i32_0 : i32, i32
  }
  func.func @transform_3(%arg0: i32) -> (i32, i32) {
    %c0_i32 = arith.constant 0 : i32
    %c0_i32_0 = arith.constant 0 : i32
    %c0_i32_1 = arith.constant 0 : i32
    return %c0_i32, %c0_i32_0 : i32, i32
  }
  func.func @transform_4(%arg0: i32) -> (i32, i32) {
    %c0_i32 = arith.constant 0 : i32
    %c0_i32_0 = arith.constant 0 : i32
    %c0_i32_1 = arith.constant 0 : i32
    return %c0_i32, %c0_i32_0 : i32, i32
  }
  func.func @transform_5(%arg0: i32) -> (i32, i32) {
    %c0_i32 = arith.constant 0 : i32
    %c0_i32_0 = arith.constant 0 : i32
    %c0_i32_1 = arith.constant 0 : i32
    return %c0_i32, %c0_i32_0 : i32, i32
  }
  func.func @transform_6(%arg0: i32) -> i32 {
    %c0_i32 = arith.constant 0 : i32
    %c0_i32_0 = arith.constant 0 : i32
    return %c0_i32 : i32
  }
  func.func @transform_7(%arg0: i32) -> (i32, i32) {
    %c0_i32 = arith.constant 0 : i32
    %c0_i32_0 = arith.constant 0 : i32
    return %c0_i32, %arg0 : i32, i32
  }
}

</mosaic_0001>

<bundles_post_ra>
// kernel: _forward_jit.1
= control target key start
LH: loop header
LB: loop body
LE: loop exit
PB: predicated region body
PF: predicated region fallthrough
CT: control target
= control target key end

     0   :  { %s835_s26 = smov 0   ;;  %s926_s0 = inlined_call_operand.vmem [shape: f32[2,512], index: 0, kind: input, shape index: {}]   ;;  %s927_s1 = inlined_call_operand.vmem [shape: f32[32,2], index: 1, kind: input, shape index: {}]   ;;  %s928_s2 = inlined_call_operand.vmem [shape: f32[32,1], index: 2, kind: input, shape index: {}]   ;;  %s929_s3 = inlined_call_operand.vmem [shape: f32[32,32], index: 3, kind: input, shape index: {}]   ;;  %s930_s4 = inlined_call_operand.vmem [shape: f32[32,1], index: 4, kind: input, shape index: {}]   ;;  %s931_s5 = inlined_call_operand.vmem [shape: f32[1,32], index: 5, kind: input, shape index: {}]   ;;  %s932_s6 = inlined_call_operand.<no memory space> [shape: f32[1], index: 6, kind: input, shape index: {}]   ;;  %s933_s7 = inlined_call_operand.vmem [shape: f32[1,512], index: 7, kind: output, shape index: {}]  }
   0x1   :  { %12 = sst [smem:[#allocation2]] %s932_s6 }
   0x2 LB: > { %s698_s27 = sadd.s32 4294967295, %s786_s26   ;;  %p702_p0 = scmp.ge.s32.totalorder %s786_s26, 1  ;;  %s786_s26 = sphi %s835_s26, %s18_s26  }
   0x3   : > { %p239_p1 = scmp.lt.s32.totalorder %s786_s26, 3 }
   0x5   : > { %p240_p2 = pnand %p702_p0, %p239_p1 }
   0x6   : > { %v286_v0 = vld [vmem:[%s927_s1 + $0x10] sm:$0xff] (!%p240_p2)  ;;  %v284_v1 = vld [vmem:[%s927_s1] sm:$0xff] (!%p240_p2)  ;;  %v788_v2 = vmov (!%p240_p2), 1   ;;  %v285_v3 = vld [vmem:[%s927_s1 + $0x8] sm:$0xff] (!%p240_p2)  ;;  %v789_v4 = vmov (!%p240_p2), 0   ;;  %v790_v14 = vmov (!%p240_p2), 0.0   ;;  %v309_v15 = vlaneseq (!%p240_p2) }
   0x7   : > { %243 = sbr.rel (%p240_p2) target bundleno = 649 (0x289), region = 48  ;;  %744 = vset.pattern.permute.xlu0 (!%p240_p2), %v788_v2  ;;  %742 = vset.pattern.permute.xlu1 (!%p240_p2), %v788_v2  ;;  %v287_v5 = vld [vmem:[%s927_s1 + $0x18] sm:$0xff] (!%p240_p2)  ;;  %v371_v6 = vld [vmem:[%s928_s2 + $0x8] sm:$0xff] (!%p240_p2)  ;;  %v370_v7 = vld [vmem:[%s928_s2] sm:$0xff] (!%p240_p2)  ;;  %s703_s6 = sshll.u32 (!%p240_p2), %s698_s27, 1  ;;  %vm438_vm0 = vcmask (!%p240_p2), 261120  }
   0x8   : > { %336 = vperm.xlu0 (!%p240_p2), %744, %v286_v0   ;;  %328 = vperm.xlu1 (!%p240_p2), %742, %v284_v1   ;;  %v414_v8 = vld [vmem:[%s930_s4] sm:$0xff] (!%p240_p2)  ;;  %v372_v9 = vld [vmem:[%s928_s2 + $0x10] sm:$0xff] (!%p240_p2)  ;;  %v373_v11 = vld [vmem:[%s928_s2 + $0x18] sm:$0xff] (!%p240_p2)  ;;  %p271_p3 = scmp.lt.s32.totalorder (!%p240_p2), %s703_s6, 3  ;;  %v887_v18 = vshrl.u32 (!%p240_p2), %v309_v15, 7  ;;  %s549_s20 = sld [smem:[#allocation2]] (!%p240_p2) }
   0x9   : > { %v416_v10 = vld [vmem:[%s930_s4 + $0x10] sm:$0xff] (!%p240_p2)  ;;  %v415_v12 = vld [vmem:[%s930_s4 + $0x8] sm:$0xff] (!%p240_p2)  ;;  %v417_v13 = vld [vmem:[%s930_s4 + $0x18] sm:$0xff] (!%p240_p2)  ;;  %515 = vmatprep.mubr.f32.mxu0 (!%p240_p2), %v790_v14  ;;  %618 = vmatprep.mubr.f32.mxu1 (!%p240_p2), %v790_v14  ;;  %vm645_vm1 = vcmp.lt.s32.totalorder (!%p240_p2), %v309_v15, 256 }
   0xa   : > { %v311_v22 = vsub.s32 (!%p240_p2), 0, %v887_v18  ;;  %v315_v23 = vsub.s32 (!%p240_p2), 1, %v887_v18 }
   0xc   : > { %745 = vset.pattern.permute.xlu0 (!%p240_p2), %v789_v4  ;;  %332 = vperm.xlu1 (!%p240_p2), %742, %v285_v3  }
   0xd   : > { %290 = vperm.xlu0 (!%p240_p2), %745, %v284_v1  }
   0xe   : > { %s935_s6 = smov (!%p271_p3, %s703_s6), 3 }
   0xf   : > { %s704_s30 = sshll.u32 %s935_s6, 1  ;;  %s279_s23 = scalar_lea.vmem %s933_s7, %s935_s6 }
  0x10   : > { %743 = vset.pattern.permute.xlu1 %v789_v4  ;;  %s274_s10 = scalar_lea.vmem %s926_s0, %s704_s30 }
  0x11   : > { %295 = vperm.xlu0 %745, %v285_v3   ;;  %305 = vperm.xlu1 %743, %v287_v5   ;;  %v281_v21 = vld [vmem:[%s274_s10] ss:$2 sm:$0x3]  ;;  %v706_v24 = vld [vmem:[%s274_s10 + $0x1] ss:$2 sm:$0x3] }
  0x12   : > { %v312_v25 = vrot.slane %v281_v21, %v311_v22  ;;  %v316_v28 = vrot.slane %v281_v21, %v315_v23  ;;  %v347_v29 = vrot.slane %v706_v24, %v311_v22  ;;  %v351_v30 = vrot.slane %v706_v24, %v315_v23  ;;  %v411_v21 = vld [vmem:[%s929_s3 + $0x8] sm:$0xff]  ;;  %v412_v22 = vld [vmem:[%s929_s3 + $0x10] sm:$0xff]  ;;  %v413_v23 = vld [vmem:[%s929_s3 + $0x18] sm:$0xff] }
  0x15   : > { %300 = vperm.xlu0 %745, %v286_v0   ;;  %746 = vset.pattern.permute.xlu1 %v788_v2 }
  0x16   : > { %340 = vperm.xlu1 %746, %v287_v5  }
  0x19   : > { %381 = vperm.xlu0 %745, %v371_v6  }
  0x1a   : > { %747 = vset.pattern.permute.xlu1 %v789_v4 }
  0x1b   : > { %376 = vperm.xlu1 %747, %v370_v7  }
  0x1d   : > { %420 = vperm.xlu0 %745, %v414_v8  }
  0x1f   : > { %386 = vperm.xlu1 %747, %v372_v9  }
  0x21   : > { %430 = vperm.xlu0 %745, %v416_v10  }
  0x23   : > { %391 = vperm.xlu1 %747, %v373_v11  }
  0x27   : > { %425 = vperm.xlu1 %747, %v415_v12  }
  0x2b   : > { %435 = vperm.xlu1 %747, %v417_v13  }
  0x87   : > { %v329_v16 = vpop.permute.xlu1 %328  ;;  %v337_v17 = vpop.permute.xlu0 %336 }
  0x88   : > { %v354_v39 = vmul.f32 %v347_v29, %v329_v16  ;;  %v355_v40 = vmul.f32 %v351_v30, %v329_v16  ;;  %v358_v51 = vmul.f32 %v347_v29, %v337_v17  ;;  %v359_v54 = vmul.f32 %v351_v30, %v337_v17 }
  0x8b   : > { %v333_v19 = vpop.permute.xlu1 %332 }
  0x8c   : > { %v291_v20 = vpop.permute.xlu0 %290  ;;  %v356_v35 = vmul.f32 %v347_v29, %v333_v19  ;;  %v357_v36 = vmul.f32 %v351_v30, %v333_v19 }
  0x8d   : > { %v319_v33 = vmul.f32 %v312_v25, %v291_v20  ;;  %v320_v37 = vmul.f32 %v316_v28, %v291_v20  ;;  %v410_v20 = vld [vmem:[%s929_s3] sm:$0xff] }
  0x8f   : > { %v362_v44 = vadd.f32 %v354_v39, %v319_v33  ;;  %v363_v48 = vadd.f32 %v355_v40, %v320_v37 }
  0x90   : > { %v296_v26 = vpop.permute.xlu0 %295  ;;  %v306_v27 = vpop.permute.xlu1 %305 }
  0x91   : > { %v321_v31 = vmul.f32 %v312_v25, %v296_v26  ;;  %v322_v32 = vmul.f32 %v316_v28, %v296_v26  ;;  %v325_v60 = vmul.f32 %v312_v25, %v306_v27  ;;  %v326_v61 = vmul.f32 %v316_v28, %v306_v27 }
  0x93   : > { %v364_v41 = vadd.f32 %v356_v35, %v321_v31  ;;  %v365_v42 = vadd.f32 %v357_v36, %v322_v32 }
  0x94   : > { %v301_v34 = vpop.permute.xlu0 %300 }
  0x95   : > { %v341_v38 = vpop.permute.xlu1 %340  ;;  %v323_v45 = vmul.f32 %v312_v25, %v301_v34  ;;  %v324_v49 = vmul.f32 %v316_v28, %v301_v34 }
  0x96   : > { %v360_v55 = vmul.f32 %v347_v29, %v341_v38  ;;  %v361_v56 = vmul.f32 %v351_v30, %v341_v38 }
  0x97   : > { %v366_v57 = vadd.f32 %v358_v51, %v323_v45  ;;  %v367_v59 = vadd.f32 %v359_v54, %v324_v49 }
  0x98   : > { %v382_v43 = vpop.permute.xlu0 %381  ;;  %v368_v0 = vadd.f32 %v360_v55, %v325_v60  ;;  %v369_v1 = vadd.f32 %v361_v56, %v326_v61  ;;  %v548_v55 = vld [vmem:[%s931_s5] sm:$0x1]  ;;  %v791_v56 = vmov 1966171168  }
  0x99   : > { %v396_v46 = vadd.f32 %v382_v43, %v364_v41  ;;  %v397_v47 = vadd.f32 %v382_v43, %v365_v42 }
  0x9a   : > { %v377_v50 = vpop.permute.xlu1 %376 }
  0x9b   : > { %748 = vtanh.f32 %v396_v46  ;;  %v394_v52 = vadd.f32 %v377_v50, %v362_v44  ;;  %v395_v53 = vadd.f32 %v377_v50, %v363_v48 }
  0x9c   : > { %750 = vtanh.f32 %v397_v47  ;;  %v421_v24 = vpop.permute.xlu0 %420 }
  0x9d   : > { %752 = vtanh.f32 %v394_v52 }
  0x9e   : > { %754 = vtanh.f32 %v395_v53  ;;  %v387_v58 = vpop.permute.xlu1 %386 }
  0x9f   : > { %v398_v62 = vadd.f32 %v387_v58, %v366_v57  ;;  %v399_v63 = vadd.f32 %v387_v58, %v367_v59  ;;  %v629_v57 = vunpack.c.l.s4 %v791_v56  ;;  %v550_v58 = vstv %s549_s20 }
  0xa1   : > { %756 = vtanh.f32 %v398_v62  ;;  %v630_v59 = vunpack.c.0.s8 %v629_v57 }
  0xa2   : > { %v392_v2 = vpop.permute.xlu1 %391  ;;  %758 = vtanh.f32 %v399_v63 }
  0xa3   : > { %v400_v3 = vadd.f32 %v392_v2, %v368_v0  ;;  %v401_v4 = vadd.f32 %v392_v2, %v369_v1  ;;  %v633_v0 = vsub.s32 %v630_v59, %v887_v18 }
  0xa5   : > { %v749_v5 = vpop.eup %748  ;;  %760 = vtanh.f32 %v400_v3 }
  0xa6   : > { %v751_v6 = vpop.eup %750  ;;  %762 = vtanh.f32 %v401_v4  ;;  %v426_v29 = vpop.permute.xlu1 %425 }
  0xa7   : > { %v753_v7 = vpop.eup %752 }
  0xa8   : > { %v755_v8 = vpop.eup %754  ;;  %v716_v9 = vpack.c.bf16 %v749_v5, %v753_v7 }
  0xa9   : > { %v714_v10 = vpack.c.bf16 %v751_v6, %v755_v8 }
  0xaa   : > { %v436_v38 = vpop.permute.xlu1 %435 }
  0xab   : > { %715 = vmatprep.subr.bf16.mxu0 %v714_v10  ;;  %v757_v11 = vpop.eup %756 }
  0xac   : > { %717 = vmatpush1.bf16.msra.mxu0 %v716_v9  ;;  %v759_v12 = vpop.eup %758 }
  0xaf   : > { %v761_v13 = vpop.eup %760 }
  0xb0   : > { %v763_v16 = vpop.eup %762  ;;  %v720_v17 = vpack.c.bf16 %v761_v13, %v757_v11 }
  0xb1   : > { %v718_v19 = vpack.c.bf16 %v763_v16, %v759_v12 }
  0xb3   : > { %719 = vmatprep.subr.bf16.mxu0 %v718_v19 }
  0xb4   : > { %721 = vmatpush1.bf16.msra.mxu0 %v720_v17 }
  0xb7   : > { %707 = vmatmul.mubr.msk.f32.vlgmr.msra.gmra.mrb[0].mxu0 %vm438_vm0, %v410_v20 }
  0xb8   : > { %521 = vmatprep.mubr.f32.mxu0 %v790_v14 }
  0xbb   : > { %708 = vmatmul.mubr.msk.f32.gmra.mrb[2].mxu0 %vm438_vm0, %v411_v21 }
  0xbc   : > { %527 = vmatprep.mubr.f32.mxu0 %v790_v14 }
  0xbf   : > { %709 = vmatmul.mubr.msk.f32.gmra.mrb[4].mxu0 %vm438_vm0, %v412_v22 }
  0xc0   : > { %533 = vmatprep.mubr.f32.mxu0 %v790_v14  ;;  %v431_v14 = vpop.permute.xlu0 %430 }
  0xc3   : > { %710 = vmatmul.mubr.msk.f32.gmra.mrb[6].mxu0 %vm438_vm0, %v413_v23 }
 0x18a   : > { %v517_v25 = vpop.f32.mrb[0].mxu0 }
 0x18b   : > { %v518_v26 = vadd.f32 %v517_v25, %v421_v24  ;;  %v519_v27 = vpop.f32.mrb[1].mxu0 }
 0x18c   : > { %v520_v28 = vadd.f32 %v519_v27, %v421_v24 }
 0x18d   : > { %764 = vtanh.f32 %v518_v26 }
 0x18e   : > { %v523_v30 = vpop.f32.mrb[2].mxu0  ;;  %766 = vtanh.f32 %v520_v28 }
 0x18f   : > { %v524_v31 = vadd.f32 %v523_v30, %v426_v29  ;;  %v525_v32 = vpop.f32.mrb[3].mxu0 }
 0x190   : > { %v526_v33 = vadd.f32 %v525_v32, %v426_v29 }
 0x191   : > { %768 = vtanh.f32 %v524_v31 }
 0x192   : > { %770 = vtanh.f32 %v526_v33  ;;  %v529_v34 = vpop.f32.mrb[4].mxu0 }
 0x193   : > { %v530_v35 = vadd.f32 %v529_v34, %v431_v14  ;;  %v531_v36 = vpop.f32.mrb[5].mxu0 }
 0x194   : > { %v532_v37 = vadd.f32 %v531_v36, %v431_v14 }
 0x195   : > { %772 = vtanh.f32 %v530_v35 }
 0x196   : > { %v535_v39 = vpop.f32.mrb[6].mxu0  ;;  %774 = vtanh.f32 %v532_v37 }
 0x197   : > { %v536_v40 = vadd.f32 %v535_v39, %v436_v38  ;;  %v537_v41 = vpop.f32.mrb[7].mxu0  ;;  %v765_v43 = vpop.eup %764 }
 0x198   : > { %v538_v42 = vadd.f32 %v537_v41, %v436_v38  ;;  %v767_v44 = vpop.eup %766 }
 0x199   : > { %776 = vtanh.f32 %v536_v40 }
 0x19a   : > { %778 = vtanh.f32 %v538_v42 }
 0x19b   : > { %v769_v45 = vpop.eup %768 }
 0x19c   : > { %v771_v46 = vpop.eup %770  ;;  %v724_v47 = vpack.c.bf16 %v769_v45, %v765_v43 }
 0x19d   : > { %v722_v48 = vpack.c.bf16 %v771_v46, %v767_v44 }
 0x19f   : > { %723 = vmatprep.subr.bf16.mxu1 %v722_v48  ;;  %v773_v49 = vpop.eup %772 }
 0x1a0   : > { %725 = vmatpush1.bf16.msra.mxu1 %v724_v47  ;;  %v775_v50 = vpop.eup %774 }
 0x1a3   : > { %v777_v51 = vpop.eup %776 }
 0x1a4   : > { %v779_v52 = vpop.eup %778  ;;  %v728_v53 = vpack.c.bf16 %v777_v51, %v773_v49 }
 0x1a5   : > { %v726_v54 = vpack.c.bf16 %v779_v52, %v775_v50 }
 0x1a7   : > { %727 = vmatprep.subr.bf16.mxu1 %v726_v54 }
 0x1a8   : > { %729 = vmatpush1.bf16.msra.mxu1 %v728_v53 }
 0x1ab   : > { %711 = vmatmul.mubr.msk.f32.vlgmr.msra.gmra.mrb[0].mxu1 %vm438_vm0, %v548_v55 }
 0x27e   : > { %v620_v60 = vpop.f32.mrb[0].mxu1 }
 0x27f   : > { %v621_v61 = vadd.f32 %v620_v60, %v550_v58  ;;  %v622_v62 = vpop.f32.mrb[1].mxu1 }
 0x280   : > { %v623_v63 = vadd.f32 %v622_v62, %v550_v58 }
 0x282   : > { %v627_v1 = vcombine.low %v621_v61, %v623_v63 }
 0x284   : > { %v634_v2 = vrot.slane %v627_v1, %v633_v0 }
 0x286   : > { %v641_v3 = vrot.slane %v634_v2, %v633_v0 }
 0x288   : > { %647 = vst.msk [vmem:[%s279_s23] sm:$0x3] %vm645_vm1, %v641_v3 }
 0x289 PF: > { %s18_s26 = sadd.s32 1, %s786_s26  }
 0x28a   : > { %p15_p4 = scmp.ge.s32.totalorder %s18_s26, 4  }
 0x28c   :  { %17 = sbr.rel (!%p15_p4) target bundleno = 2 (0x2), region = 79 }

</bundles_post_ra>
